<compile_context>
chip_gen: v5e
topology: v5e:2x2
jax: 0.10.0
libtpu: 0.0.40
codegen_flags: <defaults>
</compile_context>

<pallas_src>
import jax
import jax.numpy as jnp
from jax import lax
from jax.experimental import pallas as pl
from jax.experimental.pallas import tpu as pltpu


# ----------------------------------------------------------------------------
# Kernel
# ----------------------------------------------------------------------------
def _make_bottleneck_kernel(has_projection: bool, H: int, W: int, P: int,
                            Cexp: int):
    """Kernel for a block of Nb images in lane-packed (Nb, H, W*C) layout."""

    def kernel(x_ref, w1_ref, b1_ref, w2_ref, b2_ref, w3_ref, b3_ref, out_ref):
        Nb = x_ref.shape[0]
        M = Nb * H

        x2d = x_ref[...].reshape(M, x_ref.shape[2])        # (M, W*Cin) f32
        xb = x2d.astype(jnp.bfloat16)

        # ---- conv1 (1x1) [+ fused projection shortcut] + bn1 + ReLU --------
        y = jnp.dot(xb, w1_ref[...], preferred_element_type=jnp.float32)
        y = y + b1_ref[...]
        if has_projection:
            # Fused weight columns are [shortcut (W*Cexp) | conv1 (W*P)];
            # W*Cexp is the 128-aligned split point for the demo shapes.
            sc = y[:, :W * Cexp]                           # no ReLU on shortcut
            y1 = jnp.maximum(y[:, W * Cexp:], 0.0)         # (M, W*P)
        else:
            sc = x2d                                       # identity (f32, exact)
            y1 = jnp.maximum(y, 0.0)                       # (M, W*P)

        # ---- conv2 (3x3, pad=1): per-ky accumulating matmuls ----------------
        # Vertical zero halo per image (bf16); horizontal taps are folded into
        # the banded weights, so no lane-shift halo is needed.
        y1b = y1.astype(jnp.bfloat16).reshape(Nb, H, W * P)
        zrow = jnp.zeros((Nb, 1, W * P), jnp.bfloat16)
        t = jnp.concatenate([zrow, y1b, zrow], axis=1)     # (Nb, H+2, W*P)
        acc = jnp.zeros((M, W * P), jnp.float32)
        for ky in range(3):
            shard = t[:, ky:ky + H, :].reshape(M, W * P)
            acc = acc + jnp.dot(shard, w2_ref[ky],
                                preferred_element_type=jnp.float32)
        y2 = jnp.maximum(acc + b2_ref[...], 0.0)           # (M, W*P)

        # ---- conv3 (1x1) + bn3 ----------------------------------------------
        y3 = jnp.dot(y2.astype(jnp.bfloat16), w3_ref[...],
                     preferred_element_type=jnp.float32) + b3_ref[...]

        # ---- residual add + ReLU, lane-dense store --------------------------
        out = jnp.maximum(y3 + sc, 0.0)
        out_ref[...] = out.reshape(Nb, H, W * Cexp).astype(out_ref.dtype)

    return kernel


# ----------------------------------------------------------------------------
# Weight packing helpers (run once in the wrapper, plain JAX)
# ----------------------------------------------------------------------------
def _block_diag_1x1(w, scale, W):
    """1x1 conv (Cout,Cin,1,1) + folded BN scale -> (W*Cin, W*Cout) block-diag."""
    cout, cin = w.shape[0], w.shape[1]
    wm = w.reshape(cout, cin).T * scale[None, :]           # (cin, cout)
    eye_w = jnp.eye(W, dtype=jnp.float32)
    B = jnp.einsum('io,wv->wivo', wm, eye_w)               # (W, cin, W, cout)
    return B.reshape(W * cin, W * cout)


def _banded_3x3_per_ky(w, scale, W):
    """3x3 conv (Cout,Cin,3,3) + folded BN scale -> (3, W*Cin, W*Cout).

    B[ky][p*Cin + ci, x*Cout + co] = w[co,ci,ky,kx]*scale[co] where
    p = x + kx - 1 (out-of-range taps vanish == zero padding)."""
    cout, cin = w.shape[0], w.shape[1]
    wk = jnp.transpose(w, (2, 3, 1, 0)) * scale            # (ky, kx, ci, co)
    p = jnp.arange(W)[:, None]                             # input pixel
    v = jnp.arange(W)[None, :]                             # output pixel
    B = jnp.zeros((3, W, cin, W, cout), jnp.float32)
    for kx in range(3):
        sel = (p - v == kx - 1).astype(jnp.float32)        # (W_in, W_out)
        B = B + jnp.einsum('yio,pv->ypivo', wk[:, kx], sel)
    return B.reshape(3, W * cin, W * cout)


def _pick_nb(N, H, target_rows=256):
    """Largest divisor of N such that Nb*H <= target_rows (MXU-depth target)."""
    cap = max(1, target_rows // max(H, 1))
    best = 1
    for nb in range(1, min(N, cap) + 1):
        if N % nb == 0:
            best = nb
    return best


# ----------------------------------------------------------------------------
# Wrappers
# ----------------------------------------------------------------------------
def bottleneck_forward_packed(xp, w1, s1, b1, w2, s2, b2, w3, s3, b3,
                              w_sc=None, s_sc=None, b_sc=None, stride=1,
                              W=None, target_rows=256):
    """Bottleneck forward on a lane-packed (N, H, W*Cin) activation.

    Keep activations in this layout across chained blocks so the NCHW<->packed
    transposes are paid only at network boundaries."""
    if stride != 1:
        # TODO(synk): strided conv2 / strided projection shortcut.
        raise NotImplementedError("stride != 1 not implemented")

    N, H, WC = xp.shape
    Cin = WC // W
    P = w1.shape[0]                                        # planes
    Cexp = w3.shape[0]                                     # expansion * planes
    has_projection = w_sc is not None
    if not has_projection:
        assert Cin == Cexp, "identity shortcut requires in_planes == 4*planes"

    bf16, f32 = jnp.bfloat16, jnp.float32

    B1 = _block_diag_1x1(w1, s1, W)
    b1p = jnp.tile(b1, W).reshape(1, W * P)
    if has_projection:
        # Fuse conv1 with the projection shortcut: one LHS push through the MXU.
        Bs = _block_diag_1x1(w_sc, s_sc, W)
        bsp = jnp.tile(b_sc, W).reshape(1, W * Cexp)
        W1 = jnp.concatenate([Bs, B1], axis=1).astype(bf16)      # [shortcut|conv1]
        b1c = jnp.concatenate([bsp, b1p], axis=1).astype(f32)
    else:
        W1 = B1.astype(bf16)
        b1c = b1p.astype(f32)
    W2 = _banded_3x3_per_ky(w2, s2, W).astype(bf16)              # (3, W*P, W*P)
    b2p = jnp.tile(b2, W).reshape(1, W * P).astype(f32)
    W3 = _block_diag_1x1(w3, s3, W).astype(bf16)
    b3p = jnp.tile(b3, W).reshape(1, W * Cexp).astype(f32)

    Nb = _pick_nb(N, H, target_rows)
    grid = (N // Nb,)

    in_specs = [
        pl.BlockSpec((Nb, H, W * Cin), lambda n: (n, 0, 0)),
        pl.BlockSpec(W1.shape, lambda n: (0, 0)),
        pl.BlockSpec(b1c.shape, lambda n: (0, 0)),
        pl.BlockSpec(W2.shape, lambda n: (0, 0, 0)),
        pl.BlockSpec(b2p.shape, lambda n: (0, 0)),
        pl.BlockSpec(W3.shape, lambda n: (0, 0)),
        pl.BlockSpec(b3p.shape, lambda n: (0, 0)),
    ]
    # TODO(synk): single-buffer the constant weight/bias operands once their
    # VMEM footprint matters (production channel counts).

    # VMEM budget: double-buffered constants + 2x activation blocks + slack for
    # in-register temporaries; clamp to <= 48 MiB so v7x (64 MiB) keeps headroom.
    const_bytes = sum(int(a.size) * a.dtype.itemsize
                      for a in (W1, b1c, W2, b2p, W3, b3p))
    act_bytes = Nb * H * W * (Cin + Cexp) * 4
    tmp_bytes = 8 * Nb * H * W * max(P, Cexp) * 4
    est = 2 * const_bytes + 2 * act_bytes + tmp_bytes
    vmem_limit = int(min(48 * 1024 * 1024, max(16 * 1024 * 1024, 2 * est)))

    kernel = _make_bottleneck_kernel(has_projection, H, W, P, Cexp)

    out_packed = pl.pallas_call(
        kernel,
        out_shape=jax.ShapeDtypeStruct((N, H, W * Cexp), xp.dtype),
        grid=grid,
        in_specs=in_specs,
        out_specs=pl.BlockSpec((Nb, H, W * Cexp), lambda n: (n, 0, 0)),
        compiler_params=pltpu.CompilerParams(
            dimension_semantics=("parallel",),
            vmem_limit_bytes=vmem_limit),
    )(xp, W1, b1c, W2, b2p, W3, b3p)
    return out_packed


def bottleneck_forward(x_nchw, w1, s1, b1, w2, s2, b2, w3, s3, b3,
                       w_sc=None, s_sc=None, b_sc=None, stride=1,
                       target_rows=256):
    """NCHW entry point.  For chained blocks, prefer bottleneck_forward_packed
    and pay the layout transposes once at network boundaries."""
    N, Cin, H, W = x_nchw.shape
    Cexp = w3.shape[0]
    xp = jnp.transpose(x_nchw, (0, 2, 3, 1)).reshape(N, H, W * Cin)
    out_packed = bottleneck_forward_packed(
        xp, w1, s1, b1, w2, s2, b2, w3, s3, b3,
        w_sc, s_sc, b_sc, stride=stride, W=W, target_rows=target_rows)
    out_nhwc = out_packed.reshape(N, H, W, Cexp)
    return jnp.transpose(out_nhwc, (0, 3, 1, 2))


# ----------------------------------------------------------------------------
# Pure-JAX (XLA conv) reference mirroring the PyTorch forward in NCHW
# ----------------------------------------------------------------------------
def reference_forward(x, w1, s1, b1, w2, s2, b2, w3, s3, b3,
                      w_sc=None, s_sc=None, b_sc=None, stride=1):
    dn = ("NCHW", "OIHW", "NCHW")

    def affine(y, s, b):
        return y * s[None, :, None, None] + b[None, :, None, None]

    y = lax.conv_general_dilated(x, w1, (1, 1), ((0, 0), (0, 0)),
                                 dimension_numbers=dn,
                                 precision=lax.Precision.HIGHEST)
    y = jnp.maximum(affine(y, s1, b1), 0.0)
    y = lax.conv_general_dilated(y, w2, (stride, stride), ((1, 1), (1, 1)),
                                 dimension_numbers=dn,
                                 precision=lax.Precision.HIGHEST)
    y = jnp.maximum(affine(y, s2, b2), 0.0)
    y = lax.conv_general_dilated(y, w3, (1, 1), ((0, 0), (0, 0)),
                                 dimension_numbers=dn,
                                 precision=lax.Precision.HIGHEST)
    y = affine(y, s3, b3)
    if w_sc is not None:
        sc = lax.conv_general_dilated(x, w_sc, (stride, stride),
                                      ((0, 0), (0, 0)),
                                      dimension_numbers=dn,
                                      precision=lax.Precision.HIGHEST)
        sc = affine(sc, s_sc, b_sc)
    else:
        sc = x
    return jnp.maximum(y + sc, 0.0)


# ----------------------------------------------------------------------------
# Demo / self-test
# ----------------------------------------------------------------------------
if __name__ == "__main__":
    EPS = 1e-5

    def make_bn(k, c):
        k1, k2, k3, k4 = jax.random.split(k, 4)
        gamma = 1.0 + 0.1 * jax.random.normal(k1, (c,), jnp.float32)
        beta = 0.1 * jax.random.normal(k2, (c,), jnp.float32)
        mean = 0.1 * jax.random.normal(k3, (c,), jnp.float32)
        var = 1.0 + 0.5 * jax.random.uniform(k4, (c,), jnp.float32)
        scale = gamma / jnp.sqrt(var + EPS)
        bias = beta - mean * scale
        return scale, bias

    def run_case(key, n, in_planes, planes, hw, target_rows=256):
        expansion = 4
        cexp = expansion * planes
        keys = jax.random.split(key, 9)
        x = jax.random.normal(keys[0], (n, in_planes, hw, hw), jnp.float32)
        w1 = 0.2 * jax.random.normal(keys[1], (planes, in_planes, 1, 1),
                                     jnp.float32)
        w2 = 0.2 * jax.random.normal(keys[2], (planes, planes, 3, 3),
                                     jnp.float32)
        w3 = 0.2 * jax.random.normal(keys[3], (cexp, planes, 1, 1),
                                     jnp.float32)
        s1, b1 = make_bn(keys[4], planes)
        s2, b2 = make_bn(keys[5], planes)
        s3, b3 = make_bn(keys[6], cexp)
        if in_planes != cexp:       # projection shortcut (as in PyTorch module)
            w_sc = 0.2 * jax.random.normal(keys[7], (cexp, in_planes, 1, 1),
                                           jnp.float32)
            s_sc, b_sc = make_bn(keys[8], cexp)
        else:                       # identity shortcut
            w_sc = s_sc = b_sc = None

        out = bottleneck_forward(x, w1, s1, b1, w2, s2, b2, w3, s3, b3,
                                 w_sc, s_sc, b_sc, target_rows=target_rows)
        out = jax.block_until_ready(out)
        ref = reference_forward(x, w1, s1, b1, w2, s2, b2, w3, s3, b3,
                                w_sc, s_sc, b_sc)
        if not jnp.allclose(out, ref, rtol=3e-2, atol=3e-2):
            raise AssertionError(
                f"mismatch: max |diff| = {float(jnp.max(jnp.abs(out - ref)))}")

    k1, k2 = jax.random.split(jax.random.PRNGKey(0))
    # Projection-shortcut config: in_planes != expansion*planes (Nb=2, grid=1).
    run_case(k1, n=2, in_planes=4, planes=4, hw=16)
    # Identity-shortcut config, multi-step grid: Nb=2, grid=(2,).
    run_case(k2, n=4, in_planes=16, planes=4, hw=16, target_rows=32)
    print("KERNEL_OK")
</pallas_src>

<mosaic_0001>
module attributes {stable_mosaic.version = 11 : i64} {
  func.func @kernel(%arg0: i32, %arg1: memref<2x16x64xf32, #tpu.memory_space<vmem>>, %arg2: memref<64x320xbf16, #tpu.memory_space<vmem>>, %arg3: memref<1x320xf32, #tpu.memory_space<vmem>>, %arg4: memref<3x64x64xbf16, #tpu.memory_space<vmem>>, %arg5: memref<1x64xf32, #tpu.memory_space<vmem>>, %arg6: memref<64x256xbf16, #tpu.memory_space<vmem>>, %arg7: memref<1x256xf32, #tpu.memory_space<vmem>>, %arg8: memref<2x16x256xf32, #tpu.memory_space<vmem>>) attributes {dimension_semantics = [#tpu.dimension_semantics<parallel>], iteration_bounds = array<i64: 1>, scalar_prefetch = 0 : i64, scratch_operands = 0 : i64, tpu.core_type = #tpu.core_type<tc>, window_params = [{transform_indices = @transform_0, window_bounds = array<i64: 2, 16, 64>}, {pipeline_mode = #tpu.pipeline_mode<synchronous>, transform_indices = @transform_1, window_bounds = array<i64: 64, 320>}, {pipeline_mode = #tpu.pipeline_mode<synchronous>, transform_indices = @transform_2, window_bounds = array<i64: 1, 320>}, {pipeline_mode = #tpu.pipeline_mode<synchronous>, transform_indices = @transform_3, window_bounds = array<i64: 3, 64, 64>}, {pipeline_mode = #tpu.pipeline_mode<synchronous>, transform_indices = @transform_4, window_bounds = array<i64: 1, 64>}, {pipeline_mode = #tpu.pipeline_mode<synchronous>, transform_indices = @transform_5, window_bounds = array<i64: 64, 256>}, {pipeline_mode = #tpu.pipeline_mode<synchronous>, transform_indices = @transform_6, window_bounds = array<i64: 1, 256>}, {transform_indices = @transform_7, window_bounds = array<i64: 2, 16, 256>}]} {
    %c0 = arith.constant 0 : index
    %c0_0 = arith.constant 0 : index
    %c0_1 = arith.constant 0 : index
    %0 = vector.load %arg1[%c0, %c0_0, %c0_1] : memref<2x16x64xf32, #tpu.memory_space<vmem>>, vector<2x16x64xf32>
    %1 = vector.shape_cast %0 : vector<2x16x64xf32> to vector<32x64xf32>
    %2 = arith.truncf %1 : vector<32x64xf32> to vector<32x64xbf16>
    %c0_2 = arith.constant 0 : index
    %c0_3 = arith.constant 0 : index
    %3 = vector.load %arg2[%c0_2, %c0_3] : memref<64x320xbf16, #tpu.memory_space<vmem>>, vector<64x320xbf16>
    %cst = arith.constant dense<0.000000e+00> : vector<32x320xf32>
    %4 = tpu.matmul %2, %3, %cst {dimension_numbers = #tpu.dot_dimension_numbers<[1], [0], [0], [1], [0, 0, 1, 1], [], []>} : vector<32x64xbf16>, vector<64x320xbf16>, vector<32x320xf32> -> vector<32x320xf32>
    %c0_4 = arith.constant 0 : index
    %c0_5 = arith.constant 0 : index
    %5 = vector.load %arg3[%c0_4, %c0_5] : memref<1x320xf32, #tpu.memory_space<vmem>>, vector<1x320xf32>
    %6 = vector.broadcast %5 : vector<1x320xf32> to vector<32x320xf32>
    %7 = arith.addf %4, %6 : vector<32x320xf32>
    %8 = vector.extract_strided_slice %7 {offsets = [0, 0], sizes = [32, 256], strides = [1, 1]} : vector<32x320xf32> to vector<32x256xf32>
    %9 = vector.extract_strided_slice %7 {offsets = [0, 256], sizes = [32, 64], strides = [1, 1]} : vector<32x320xf32> to vector<32x64xf32>
    %cst_6 = arith.constant 0.000000e+00 : f32
    %10 = vector.broadcast %cst_6 : f32 to vector<32x64xf32>
    %11 = arith.maximumf %9, %10 : vector<32x64xf32>
    %12 = arith.truncf %11 : vector<32x64xf32> to vector<32x64xbf16>
    %13 = vector.shape_cast %12 : vector<32x64xbf16> to vector<2x16x64xbf16>
    %cst_7 = arith.constant 0.000000e+00 : bf16
    %14 = vector.broadcast %cst_7 : bf16 to vector<2x1x64xbf16>
    %15 = tpu.concatenate %14, %13, %14 in 1 : vector<2x1x64xbf16>, vector<2x16x64xbf16>, vector<2x1x64xbf16> -> vector<2x18x64xbf16>
    %cst_8 = arith.constant 0.000000e+00 : f32
    %16 = vector.broadcast %cst_8 : f32 to vector<32x64xf32>
    %17 = vector.extract_strided_slice %15 {offsets = [0, 0, 0], sizes = [2, 16, 64], strides = [1, 1, 1]} : vector<2x18x64xbf16> to vector<2x16x64xbf16>
    %18 = vector.shape_cast %17 : vector<2x16x64xbf16> to vector<32x64xbf16>
    %c0_9 = arith.constant 0 : index
    %c0_10 = arith.constant 0 : index
    %c0_11 = arith.constant 0 : index
    %19 = vector.load %arg4[%c0_9, %c0_10, %c0_11] : memref<3x64x64xbf16, #tpu.memory_space<vmem>>, vector<1x64x64xbf16>
    %20 = vector.shape_cast %19 : vector<1x64x64xbf16> to vector<64x64xbf16>
    %cst_12 = arith.constant dense<0.000000e+00> : vector<32x64xf32>
    %21 = tpu.matmul %18, %20, %cst_12 {dimension_numbers = #tpu.dot_dimension_numbers<[1], [0], [0], [1], [0, 0, 1, 1], [], []>} : vector<32x64xbf16>, vector<64x64xbf16>, vector<32x64xf32> -> vector<32x64xf32>
    %22 = arith.addf %16, %21 : vector<32x64xf32>
    %23 = vector.extract_strided_slice %15 {offsets = [0, 1, 0], sizes = [2, 16, 64], strides = [1, 1, 1]} : vector<2x18x64xbf16> to vector<2x16x64xbf16>
    %24 = vector.shape_cast %23 : vector<2x16x64xbf16> to vector<32x64xbf16>
    %c1 = arith.constant 1 : index
    %c0_13 = arith.constant 0 : index
    %c0_14 = arith.constant 0 : index
    %25 = vector.load %arg4[%c1, %c0_13, %c0_14] : memref<3x64x64xbf16, #tpu.memory_space<vmem>>, vector<1x64x64xbf16>
    %26 = vector.shape_cast %25 : vector<1x64x64xbf16> to vector<64x64xbf16>
    %cst_15 = arith.constant dense<0.000000e+00> : vector<32x64xf32>
    %27 = tpu.matmul %24, %26, %cst_15 {dimension_numbers = #tpu.dot_dimension_numbers<[1], [0], [0], [1], [0, 0, 1, 1], [], []>} : vector<32x64xbf16>, vector<64x64xbf16>, vector<32x64xf32> -> vector<32x64xf32>
    %28 = arith.addf %22, %27 : vector<32x64xf32>
    %29 = vector.extract_strided_slice %15 {offsets = [0, 2, 0], sizes = [2, 16, 64], strides = [1, 1, 1]} : vector<2x18x64xbf16> to vector<2x16x64xbf16>
    %30 = vector.shape_cast %29 : vector<2x16x64xbf16> to vector<32x64xbf16>
    %c2 = arith.constant 2 : index
    %c0_16 = arith.constant 0 : index
    %c0_17 = arith.constant 0 : index
    %31 = vector.load %arg4[%c2, %c0_16, %c0_17] : memref<3x64x64xbf16, #tpu.memory_space<vmem>>, vector<1x64x64xbf16>
    %32 = vector.shape_cast %31 : vector<1x64x64xbf16> to vector<64x64xbf16>
    %cst_18 = arith.constant dense<0.000000e+00> : vector<32x64xf32>
    %33 = tpu.matmul %30, %32, %cst_18 {dimension_numbers = #tpu.dot_dimension_numbers<[1], [0], [0], [1], [0, 0, 1, 1], [], []>} : vector<32x64xbf16>, vector<64x64xbf16>, vector<32x64xf32> -> vector<32x64xf32>
    %34 = arith.addf %28, %33 : vector<32x64xf32>
    %c0_19 = arith.constant 0 : index
    %c0_20 = arith.constant 0 : index
    %35 = vector.load %arg5[%c0_19, %c0_20] : memref<1x64xf32, #tpu.memory_space<vmem>>, vector<1x64xf32>
    %36 = vector.broadcast %35 : vector<1x64xf32> to vector<32x64xf32>
    %37 = arith.addf %34, %36 : vector<32x64xf32>
    %cst_21 = arith.constant 0.000000e+00 : f32
    %38 = vector.broadcast %cst_21 : f32 to vector<32x64xf32>
    %39 = arith.maximumf %37, %38 : vector<32x64xf32>
    %40 = arith.truncf %39 : vector<32x64xf32> to vector<32x64xbf16>
    %c0_22 = arith.constant 0 : index
    %c0_23 = arith.constant 0 : index
    %41 = vector.load %arg6[%c0_22, %c0_23] : memref<64x256xbf16, #tpu.memory_space<vmem>>, vector<64x256xbf16>
    %cst_24 = arith.constant dense<0.000000e+00> : vector<32x256xf32>
    %42 = tpu.matmul %40, %41, %cst_24 {dimension_numbers = #tpu.dot_dimension_numbers<[1], [0], [0], [1], [0, 0, 1, 1], [], []>} : vector<32x64xbf16>, vector<64x256xbf16>, vector<32x256xf32> -> vector<32x256xf32>
    %c0_25 = arith.constant 0 : index
    %c0_26 = arith.constant 0 : index
    %43 = vector.load %arg7[%c0_25, %c0_26] : memref<1x256xf32, #tpu.memory_space<vmem>>, vector<1x256xf32>
    %44 = vector.broadcast %43 : vector<1x256xf32> to vector<32x256xf32>
    %45 = arith.addf %42, %44 : vector<32x256xf32>
    %46 = arith.addf %45, %8 : vector<32x256xf32>
    %cst_27 = arith.constant 0.000000e+00 : f32
    %47 = vector.broadcast %cst_27 : f32 to vector<32x256xf32>
    %48 = arith.maximumf %46, %47 : vector<32x256xf32>
    %49 = vector.shape_cast %48 : vector<32x256xf32> to vector<2x16x256xf32>
    %c0_28 = arith.constant 0 : index
    %c0_29 = arith.constant 0 : index
    %c0_30 = arith.constant 0 : index
    %50 = vector.load %arg8[%c0_28, %c0_29, %c0_30] : memref<2x16x256xf32, #tpu.memory_space<vmem>>, vector<2x16x256xf32>
    tpu.vector_store %arg8[%c0_28, %c0_29, %c0_30], %49 {strides = array<i32>} : memref<2x16x256xf32, #tpu.memory_space<vmem>>, vector<2x16x256xf32>,
    return
  }
  func.func @transform_0(%arg0: i32) -> (i32, i32, i32) {
    %c0_i32 = arith.constant 0 : i32
    %c0_i32_0 = arith.constant 0 : i32
    %c0_i32_1 = arith.constant 0 : i32
    return %arg0, %c0_i32, %c0_i32_0 : i32, i32, i32
  }
  func.func @transform_1(%arg0: i32) -> (i32, i32) {
    %c0_i32 = arith.constant 0 : i32
    %c0_i32_0 = arith.constant 0 : i32
    %c0_i32_1 = arith.constant 0 : i32
    return %c0_i32, %c0_i32_0 : i32, i32
  }
  func.func @transform_2(%arg0: i32) -> (i32, i32) {
    %c0_i32 = arith.constant 0 : i32
    %c0_i32_0 = arith.constant 0 : i32
    %c0_i32_1 = arith.constant 0 : i32
    return %c0_i32, %c0_i32_0 : i32, i32
  }
  func.func @transform_3(%arg0: i32) -> (i32, i32, i32) {
    %c0_i32 = arith.constant 0 : i32
    %c0_i32_0 = arith.constant 0 : i32
    %c0_i32_1 = arith.constant 0 : i32
    %c0_i32_2 = arith.constant 0 : i32
    return %c0_i32, %c0_i32_0, %c0_i32_1 : i32, i32, i32
  }
  func.func @transform_4(%arg0: i32) -> (i32, i32) {
    %c0_i32 = arith.constant 0 : i32
    %c0_i32_0 = arith.constant 0 : i32
    %c0_i32_1 = arith.constant 0 : i32
    return %c0_i32, %c0_i32_0 : i32, i32
  }
  func.func @transform_5(%arg0: i32) -> (i32, i32) {
    %c0_i32 = arith.constant 0 : i32
    %c0_i32_0 = arith.constant 0 : i32
    %c0_i32_1 = arith.constant 0 : i32
    return %c0_i32, %c0_i32_0 : i32, i32
  }
  func.func @transform_6(%arg0: i32) -> (i32, i32) {
    %c0_i32 = arith.constant 0 : i32
    %c0_i32_0 = arith.constant 0 : i32
    %c0_i32_1 = arith.constant 0 : i32
    return %c0_i32, %c0_i32_0 : i32, i32
  }
  func.func @transform_7(%arg0: i32) -> (i32, i32, i32) {
    %c0_i32 = arith.constant 0 : i32
    %c0_i32_0 = arith.constant 0 : i32
    %c0_i32_1 = arith.constant 0 : i32
    return %arg0, %c0_i32, %c0_i32_0 : i32, i32, i32
  }
}

</mosaic_0001>

<bundles_post_ra>
// kernel: tpu_custom_call.1
= control target key start
LH: loop header
LB: loop body
LE: loop exit
PB: predicated region body
PF: predicated region fallthrough
CT: control target
= control target key end

     0   :  { %12 = vsyncpa [#allocation3], 0  ;;  %s1155_s0 = inlined_call_operand.hbm [shape: f32[2,16,64], index: 0, kind: input, shape index: {}]   ;;  %s1156_s1 = inlined_call_operand.hbm [shape: bf16[64,320], index: 1, kind: input, shape index: {}]   ;;  %s1157_s2 = inlined_call_operand.hbm [shape: f32[1,320], index: 2, kind: input, shape index: {}]   ;;  %s1158_s3 = inlined_call_operand.hbm [shape: bf16[3,64,64], index: 3, kind: input, shape index: {}]   ;;  %s1159_s4 = inlined_call_operand.vmem [shape: f32[1,64], index: 4, kind: input, shape index: {}]   ;;  %s1160_s5 = inlined_call_operand.hbm [shape: bf16[64,256], index: 5, kind: input, shape index: {}]   ;;  %s1161_s6 = inlined_call_operand.vmem [shape: f32[1,256], index: 6, kind: input, shape index: {}]   ;;  %s1162_s7 = inlined_call_operand.hbm [shape: f32[2,16,256], index: 7, kind: output, shape index: {}]  }
   0x1   :  { %13 = vsyncpa [#allocation6], 0 }
   0x2   :  { %14 = vsyncpa [#allocation9], 0  ;;  %s33_s26 = sshll.u32 %s1156_s1, 4  ;;  %s34_s26 = int_to_ptr.hbm [resolvable:$true] %s33_s26 }
   0x3   :  { %15 = vsyncpa [#allocation4], 0  ;;  %s1016_s27 = smov [#allocation5]   ;;  %s57_s8 = sshll.u32 %s1158_s3, 4  ;;  %s58_s8 = int_to_ptr.hbm [resolvable:$true] %s57_s8 }
   0x4   :  { %s35_s28 = sshll.u32 %s1016_s27, 4  ;;  %s1017_s9 = smov 192   ;;  %s36_s28 = int_to_ptr.vmem [resolvable:$true] %s35_s28 }
   0x5   :  { %s1018_s10 = smov 12   ;;  %s1019_s11 = smov [#allocation8]  }
   0x6   :  { %41 = dma.hbm_to_vmem [thread:$0]  %s34_s26, 1536, %s36_s28, [#allocation6], %s1017_s9, %s1017_s9, %s1018_s10  }
   0x7   :  { %s59_s12 = sshll.u32 %s1019_s11, 4  ;;  %s1020_s13 = smov 64   ;;  %s60_s12 = int_to_ptr.vmem [resolvable:$true] %s59_s12 }
   0x8   :  { %s1021_s14 = smov 4   ;;  %s20_s16 = sshll.u32 %s1155_s0, 4  ;;  %s21_s16 = int_to_ptr.hbm [resolvable:$true] %s20_s16 }
   0x9   :  { %65 = dma.hbm_to_vmem [thread:$0]  %s58_s8, 1536, %s60_s12, [#allocation9], %s1020_s13, %s1020_s13, %s1021_s14  }
   0xa   :  { %s1022_s17 = smov [#allocation2]   ;;  %s47_s20 = sshll.u32 %s1157_s2, 4  ;;  %s48_s20 = int_to_ptr.hbm [resolvable:$true] %s47_s20 }
   0xb   :  { %s22_s18 = sshll.u32 %s1022_s17, 4  ;;  %s1023_s21 = smov 128   ;;  %s23_s18 = int_to_ptr.vmem [resolvable:$true] %s22_s18 }
   0xc   :  { %s1024_s22 = smov 8   ;;  %s1025_s23 = smov [#allocation7]  }
   0xd   :  { %28 = dma.hbm_to_vmem [thread:$0]  %s21_s16, 512, %s23_s18, [#allocation3], %s1023_s21, %s1023_s21, %s1024_s22  }
   0xe   :  { %s49_s24 = sshll.u32 %s1025_s23, 4  ;;  %s72_s27 = sshll.u32 %s1160_s5, 4  ;;  %s50_s24 = int_to_ptr.vmem [resolvable:$true] %s49_s24  ;;  %s73_s27 = int_to_ptr.hbm [resolvable:$true] %s72_s27 }
   0xf   :  { %52 = dma.hbm_to_vmem [thread:$0]  %s48_s20, 48, %s50_s24, [#allocation6]  }
  0x10   :  { %s1026_s0 = smov [#allocation10]  }
  0x11   :  { %s74_s28 = sshll.u32 %s1026_s0, 4  ;;  %s75_s28 = int_to_ptr.vmem [resolvable:$true] %s74_s28 }
  0x12   :  { %80 = dma.hbm_to_vmem [thread:$0]  %s73_s27, 1024, %s75_s28, [#allocation9], %s1023_s21, %s1023_s21, %s1024_s22  }
  0x13   :  { %1008 = dma.done.wait [#allocation3], 512  }
  0x14   :  { %1009 = vsyncadd [#allocation3], 4294966784 }
  0x15   :  { %1010 = dma.done.wait [#allocation6], 1584  }
  0x16   :  { %1011 = vsyncadd [#allocation6], 4294965712 }
  0x17   :  { %1012 = dma.done.wait [#allocation9], 2560  }
  0x18   :  { %1013 = vsyncadd [#allocation9], 4294964736  ;;  %v719_v0 = vld [vmem:[#allocation5 + $0x50] sm:$0xf]  ;;  %v828_v1 = vld [vmem:[#allocation5 + $0x58] sm:$0xf0] }
  0x19   :  { %v707_v2 = vld [vmem:[#allocation5 + $0x38] sm:$0xf]  ;;  %v720_v3 = vor.u32 %v828_v1, %v719_v0  ;;  %v825_v4 = vld [vmem:[#allocation5 + $0x40] sm:$0xf0]  ;;  %v695_v6 = vld [vmem:[#allocation5 + $0x20] sm:$0xf] }
  0x1a   :  { %v708_v5 = vor.u32 %v825_v4, %v707_v2  ;;  %v822_v7 = vld [vmem:[#allocation5 + $0x28] sm:$0xf0]  ;;  %v711_v8 = vld [vmem:[#allocation5 + $0x48] sm:$0xf]  ;;  %v827_v9 = vld [vmem:[#allocation5 + $0x50] sm:$0xf0] }
  0x1b   :  { %247 = vmatpush.bf16.msra.mxu2 %v720_v3  ;;  %v826_v10 = vld [vmem:[#allocation5 + $0x4c] sm:$0xf]  ;;  %v712_v11 = vor.u32 %v827_v9, %v711_v8  ;;  %v713_v12 = vld [vmem:[#allocation5 + $0x54] sm:$0xf0]  ;;  %v699_v13 = vld [vmem:[#allocation5 + $0x30] sm:$0xf]  ;;  %v696_v18 = vor.u32 %v822_v7, %v695_v6 }
  0x1c   :  { %v824_v14 = vld [vmem:[#allocation5 + $0x38] sm:$0xf0]  ;;  %v716_v15 = vor.u32 %v826_v10, %v713_v12  ;;  %v823_v16 = vld [vmem:[#allocation5 + $0x34] sm:$0xf]  ;;  %v701_v17 = vld [vmem:[#allocation5 + $0x3c] sm:$0xf0] }
  0x1d   :  { %v683_v19 = vld [vmem:[#allocation5 + $0x8] sm:$0xf]  ;;  %209 = vmatpush.bf16.msra.mxu0 %v712_v11  ;;  %v700_v20 = vor.u32 %v824_v14, %v699_v13  ;;  %v819_v21 = vld [vmem:[#allocation5 + $0x10] sm:$0xf0]  ;;  %v704_v22 = vor.u32 %v823_v16, %v701_v17  ;;  %v687_v23 = vld [vmem:[#allocation5 + $0x18] sm:$0xf] }
  0x1e   :  { %228 = vmatpush.bf16.msra.mxu1 %v716_v15  ;;  %v821_v24 = vld [vmem:[#allocation5 + $0x20] sm:$0xf0]  ;;  %v820_v25 = vld [vmem:[#allocation5 + $0x1c] sm:$0xf]  ;;  %v689_v26 = vld [vmem:[#allocation5 + $0x24] sm:$0xf0]  ;;  %v684_v27 = vor.u32 %v819_v21, %v683_v19 }
  0x1f   :  { %248 = vmatpush.bf16.msra.mxu2 %v708_v5  ;;  %v104_v28 = vld [vmem:[#allocation2] sm:$0xff]  ;;  %v105_v29 = vld [vmem:[#allocation2 + $0x8] sm:$0xff]  ;;  %v688_v30 = vor.u32 %v821_v24, %v687_v23  ;;  %v692_v31 = vor.u32 %v820_v25, %v689_v26  ;;  %v677_v35 = vld [vmem:[#allocation5 + $0xc] sm:$0xf0]  ;;  %vm198_vm0 = vcmask 523264   ;;  %vm298_vm1 = vcmask 1040384  }
  0x20   :  { %v675_v32 = vld [vmem:[#allocation5] sm:$0xf]  ;;  %v818_v33 = vld [vmem:[#allocation5 + $0x8] sm:$0xf0]  ;;  %v817_v34 = vld [vmem:[#allocation5 + $0x4] sm:$0xf]  ;;  %v108_v36 = vpack.c.bf16 %v105_v29, %v104_v28 }
  0x21   :  { %210 = vmatpush.bf16.msra.mxu0 %v700_v20  ;;  %v676_v37 = vor.u32 %v818_v33, %v675_v32  ;;  %v680_v38 = vor.u32 %v817_v34, %v677_v35  ;;  %v106_v39 = vld [vmem:[#allocation2 + $0x10] sm:$0xff]  ;;  %v107_v40 = vld [vmem:[#allocation2 + $0x18] sm:$0xff]  ;;  %v829_v50 = vld [vmem:[#allocation8] sm:$0xff]  ;;  %vm299_vm2 = vsmask.f32 256  ;;  %vm447_vm4 = vcmask 1046528  }
  0x22   :  { %229 = vmatpush.bf16.msra.mxu1 %v704_v22  ;;  %v109_v41 = vpack.c.bf16 %v107_v40, %v106_v39  ;;  %v832_v42 = vld [vmem:[#allocation8 + $0x18] sm:$0xff]  ;;  %v831_v44 = vld [vmem:[#allocation8 + $0x10] sm:$0xff]  ;;  %v830_v47 = vld [vmem:[#allocation8 + $0x8] sm:$0xff]  ;;  %vm313_vm5 = vsmask.f32 7424  ;;  %s658_s10 = sshll.u32 %s1162_s7, 4  ;;  %s659_s10 = int_to_ptr.hbm [resolvable:$true] %s658_s10 }
  0x23   :  { %249 = vmatpush.bf16.msra.mxu2 %v696_v18  ;;  %v840_v43 = vld [vmem:[#allocation8 + $0x58] sm:$0xff]  ;;  %v839_v45 = vld [vmem:[#allocation8 + $0x50] sm:$0xff]  ;;  %v838_v49 = vld [vmem:[#allocation8 + $0x48] sm:$0xff]  ;;  %s1028_s11 = smov 256   ;;  %s1029_s12 = smov 16  }
  0x24   :  { %v836_v46 = vld [vmem:[#allocation8 + $0x38] sm:$0xff]  ;;  %v835_v48 = vld [vmem:[#allocation8 + $0x30] sm:$0xff]  ;;  %v834_v51 = vld [vmem:[#allocation8 + $0x28] sm:$0xff] }
  0x25   :  { %211 = vmatpush.bf16.msra.mxu0 %v688_v30  ;;  %381 = vmatpush.bf16.msra.mxu3 %v836_v46  ;;  %v837_v52 = vld [vmem:[#allocation8 + $0x40] sm:$0xff]  ;;  %v1091_v53 = vld [vmem:[#allocation7] sm:$0x7]  ;;  %vm1094_vm3 = vmand %vm298_vm1, %vm299_vm2 }
  0x26   :  { %230 = vmatpush.bf16.msra.mxu1 %v692_v31  ;;  %v833_v54 = vld [vmem:[#allocation8 + $0x20] sm:$0xff]  ;;  %v130_v55 = vperm.slane %v1091_v53, 2  ;;  %v793_v6 = vld [vmem:[#allocation10 + $0x18] sm:$0xf0] }
  0x27   :  { %250 = vmatpush.bf16.msra.mxu2 %v684_v27 }
  0x29   :  { %212 = vmatpush.bf16.msra.mxu0 %v676_v37  ;;  %382 = vmatpush.bf16.msra.mxu3 %v835_v48  ;;  %v807_v48 = vld [vmem:[#allocation10 + $0x30] sm:$0xf] }
  0x2a   :  { %725 = vmatmul.msk.bf16.vlgmr.msra.gmra.mxu2 %vm198_vm0, %v108_v36  ;;  %231 = vmatpush.bf16.msra.mxu1 %v680_v38 }
  0x2c   :  { %721 = vmatmul.msk.bf16.vlgmr.msra.gmra.mxu0 %vm198_vm0, %v108_v36 }
  0x2d   :  { %723 = vmatmul.msk.bf16.vlgmr.msra.gmra.mxu1 %vm198_vm0, %v108_v36  ;;  %428 = vmatpush.bf16.msrb.mxu0 %v832_v42 }
  0x2e   :  { %497 = vmatpush.bf16.msrb.mxu1 %v840_v43  ;;  %383 = vmatpush.bf16.msra.mxu3 %v834_v51 }
  0x31   :  { %429 = vmatpush.bf16.msrb.mxu0 %v831_v44 }
  0x32   :  { %498 = vmatpush.bf16.msrb.mxu1 %v839_v45  ;;  %384 = vmatpush.bf16.msra.mxu3 %v833_v54  ;;  %v809_v54 = vld [vmem:[#allocation10 + $0x38] sm:$0xf0] }
  0x35   :  { %430 = vmatpush.bf16.msrb.mxu0 %v830_v47 }
  0x36   :  { %499 = vmatpush.bf16.msrb.mxu1 %v838_v49  ;;  %v848_v49 = vld [vmem:[#allocation10 + $0x34] sm:$0xf0] }
  0x39   :  { %431 = vmatpush.bf16.msrb.mxu0 %v829_v50  ;;  %v847_v50 = vld [vmem:[#allocation10 + $0x34] sm:$0xf] }
  0x3a   :  { %726 = vmatmul.msk.bf16.gmra.mxu2 %vm198_vm0, %v109_v41  ;;  %500 = vmatpush.bf16.msrb.mxu1 %v837_v52  ;;  %v808_v52 = vor.u32 %v848_v49, %v807_v48  ;;  %v538_v48 = vld [vmem:[%s1161_s6] sm:$0x3]  ;;  %v128_v49 = vperm.slane %v1091_v53, 0  ;;  %s1027_s6 = smov [#allocation11]  }
  0x3b   :  { %s656_s30 = sshll.u32 %s1027_s6, 4  ;;  %s657_s30 = int_to_ptr.vmem [resolvable:$true] %s656_s30 }
  0x3c   :  { %722 = vmatmul.msk.bf16.gmra.mxu0 %vm198_vm0, %v109_v41  ;;  %594 = vmatpush.bf16.msrb.mxu2 %v808_v52  ;;  %v540_v52 = vperm.slane %v538_v48, 0 }
  0x3d   :  { %724 = vmatmul.msk.bf16.gmra.mxu1 %vm198_vm0, %v109_v41 }
  0xa9   :  { %v1116_v47 = vpop.f32.mrf.mxu0 }
  0xaa   :  { %v1118_v51 = vpop.f32.mrf.mxu1 }
  0xad   :  { %v252_v56 = vpop.f32.mrf.mxu2 }
  0xae   :  { %v253_v57 = vadd.f32 %v252_v56, %v130_v55  ;;  %v799_v56 = vld [vmem:[#allocation10 + $0x20] sm:$0xf] }
  0xb0   :  { %v262_v58 = vmax.f32 %v253_v57, 0.0  ;;  %v846_v57 = vld [vmem:[#allocation10 + $0x24] sm:$0xf0] }
  0xb2   :  { %v266_v61 = vpack.c.bf16 %v262_v58, %v262_v58  ;;  %v845_v58 = vld [vmem:[#allocation10 + $0x24] sm:$0xf] }
  0xb4   :  { %v274_v0 = vunpack.c.l.b16 %v266_v61  ;;  %v801_v61 = vld [vmem:[#allocation10 + $0x28] sm:$0xf0] }
  0xb5   :  { %v254_v59 = vpop.f32.mrf.mxu2 }
  0xb6   :  { %v255_v60 = vadd.f32 %v254_v59, %v130_v55  ;;  %v1120_v59 = vpop.f32.mrf.mxu0 }
  0xb8   :  { %v263_v62 = vmax.f32 %v255_v60, 0.0  ;;  %v800_v60 = vor.u32 %v846_v57, %v799_v56  ;;  %v215_v57 = vadd.f32 %v1116_v47, %v128_v49 }
  0xba   :  { %v267_v63 = vpack.c.bf16 %v263_v62, %v263_v62  ;;  %v804_v62 = vor.u32 %v845_v58, %v801_v61  ;;  %595 = vmatpush.bf16.msrb.mxu2 %v800_v60 }
  0xbc   :  { %v275_v1 = vunpack.c.l.b16 %v267_v63  ;;  %v1122_v63 = vpop.f32.mrf.mxu1 }
  0xbd   :  { %v257_v2 = vpop.f32.mrf.mxu2 }
  0xbe   :  { %v278_v3 = vpack.c.b16 %v275_v1, %v274_v0  ;;  %v258_v5 = vadd.f32 %v257_v2, %v130_v55  ;;  %v1124_v0 = vpop.f32.mrf.mxu0  ;;  %v791_v1 = vld [vmem:[#allocation10 + $0x10] sm:$0xf]  ;;  %v844_v2 = vld [vmem:[#allocation10 + $0x14] sm:$0xf0] }
  0xc0   :  { %v281_v4 = vshrl.u32 %v278_v3, 16  ;;  %v284_v8 = vshll.u32 %v278_v3, 16  ;;  %v264_v9 = vmax.f32 %v258_v5, 0.0  ;;  %v843_v3 = vld [vmem:[#allocation10 + $0x14] sm:$0xf]  ;;  %v792_v5 = vor.u32 %v844_v2, %v791_v1 }
  0xc2   :  { %v283_v7 = vrot.slane %v281_v4, 7  ;;  %v268_v19 = vpack.c.bf16 %v264_v9, %v264_v9  ;;  %596 = vmatpush.bf16.msrb.mxu2 %v792_v5  ;;  %v842_v9 = vld [vmem:[#allocation10 + $0x4] sm:$0xf0] }
  0xc4   :  { %v286_v10 = vor.u32 %v284_v8, %v283_v7  ;;  %v303_v11 = vsel %vm1094_vm3, %v283_v7, 0  ;;  %v276_v27 = vunpack.c.l.b16 %v268_v19  ;;  %v1126_v4 = vpop.f32.mrf.mxu1  ;;  %v796_v7 = vor.u32 %v843_v3, %v793_v6  ;;  %v783_v8 = vld [vmem:[#allocation10] sm:$0xf] }
  0xc5   :  { %v259_v12 = vpop.f32.mrf.mxu2  ;;  %v449_v17 = vrot.slane %v303_v11, 1  ;;  %v322_v18 = vshll.u32 %v303_v11, 16  ;;  %v784_v11 = vor.u32 %v842_v9, %v783_v8 }
  0xc6   :  { %v260_v13 = vadd.f32 %v259_v12, %v130_v55  ;;  %v301_v14 = vsel %vm1094_vm3, 0, %v286_v10  ;;  %v812_v55 = vor.u32 %v847_v50, %v809_v54  ;;  %v841_v10 = vld [vmem:[#allocation10 + $0x4] sm:$0xf]  ;;  %v785_v12 = vld [vmem:[#allocation10 + $0x8] sm:$0xf0]  ;;  %v129_v50 = vperm.slane %v1091_v53, 1 }
  0xc7   :  { %v317_v15 = vshll.u32 %v301_v14, 16  ;;  %761 = vmatmul.msk.bf16.vlgmr.msrb.gmra.mxu0 %vm198_vm0, %v301_v14  ;;  %v448_v16 = vrot.slane %v301_v14, 1  ;;  %v315_v21 = vshrl.u32 %v301_v14, 16  ;;  %v324_v26 = vrot.slane %v322_v18, 1  ;;  %v1128_v14 = vpop.f32.mrf.mxu0  ;;  %597 = vmatpush.bf16.msrb.mxu2 %v784_v11 }
  0xc8   :  { %v265_v20 = vmax.f32 %v260_v13, 0.0  ;;  %613 = vmatpush.bf16.msrb.mxu3 %v812_v55  ;;  %v788_v13 = vor.u32 %v841_v10, %v785_v12  ;;  %v541_v54 = vperm.slane %v538_v48, 1  ;;  %v234_v58 = vadd.f32 %v1118_v51, %v129_v50 }
  0xc9   :  { %v319_v22 = vrot.slane %v317_v15, 1  ;;  %v450_v23 = vsel %vm447_vm4, %v448_v16, %v449_v17  ;;  %v217_v53 = vadd.f32 %v1120_v59, %v128_v49 }
  0xca   :  { %v269_v24 = vpack.c.bf16 %v265_v20, %v265_v20  ;;  %779 = vmatmul.msk.bf16.vlgmr.msrb.gmra.mxu1 %vm198_vm0, %v450_v23  ;;  %v863_v23 = vld [vmem:[%s1159_s4] ss:$0 sm:$0xff] }
  0xcb   :  { %v320_v25 = vor.u32 %v319_v22, %v315_v21 }
  0xcc   :  { %v277_v28 = vunpack.c.l.b16 %v269_v24  ;;  %614 = vmatpush.bf16.msrb.mxu3 %v804_v62  ;;  %v1130_v15 = vpop.f32.mrf.mxu1 }
  0xcd   :  { %v325_v29 = vsel %vm313_vm5, %v320_v25, %v324_v26 }
  0xce   :  { %v279_v30 = vpack.c.b16 %v277_v28, %v276_v27  ;;  %743 = vmatmul.msk.bf16.vlgmr.msra.gmra.mxu3 %vm198_vm0, %v325_v29 }
  0xd0   :  { %v288_v31 = vshrl.u32 %v279_v30, 16  ;;  %v291_v33 = vshll.u32 %v279_v30, 16  ;;  %615 = vmatpush.bf16.msrb.mxu3 %v796_v7  ;;  %v236_v7 = vadd.f32 %v1122_v63, %v129_v50 }
  0xd2   :  { %v290_v32 = vrot.slane %v288_v31, 7 }
  0xd4   :  { %v293_v34 = vor.u32 %v291_v33, %v290_v32  ;;  %v304_v35 = vsel %vm1094_vm3, %v290_v32, 0  ;;  %616 = vmatpush.bf16.msrb.mxu3 %v788_v13 }
  0xd5   :  { %v452_v39 = vrot.slane %v304_v35, 1  ;;  %v334_v40 = vshll.u32 %v304_v35, 16 }
  0xd6   :  { %v302_v36 = vsel %vm1094_vm3, 0, %v293_v34 }
  0xd7   :  { %v329_v37 = vshll.u32 %v302_v36, 16  ;;  %762 = vmatmul.msk.bf16.gmra.mxu0 %vm198_vm0, %v302_v36  ;;  %v451_v38 = vrot.slane %v302_v36, 1  ;;  %v327_v41 = vshrl.u32 %v302_v36, 16  ;;  %v336_v45 = vrot.slane %v334_v40, 1 }
  0xd9   :  { %v331_v42 = vrot.slane %v329_v37, 1  ;;  %v453_v43 = vsel %vm447_vm4, %v451_v38, %v452_v39 }
  0xda   :  { %780 = vmatmul.msk.bf16.gmra.mxu1 %vm198_vm0, %v453_v43 }
  0xdb   :  { %v332_v44 = vor.u32 %v331_v42, %v327_v41 }
  0xdd   :  { %v337_v46 = vsel %vm313_vm5, %v332_v44, %v336_v45 }
  0xde   :  { %744 = vmatmul.msk.bf16.gmra.mxu3 %vm198_vm0, %v337_v46 }
 0x144   :  { %v433_v16 = vpop.f32.mrf.mxu0 }
 0x147   :  { %v502_v17 = vpop.f32.mrf.mxu1 }
 0x14c   :  { %v435_v20 = vpop.f32.mrf.mxu0 }
 0x14f   :  { %v504_v21 = vpop.f32.mrf.mxu1 }
 0x151   :  { %v386_v18 = vpop.f32.mrf.mxu3 }
 0x152   :  { %v434_v19 = vadd.f32 %v433_v16, %v386_v18  ;;  %v220_v16 = vadd.f32 %v1124_v0, %v128_v49 }
 0x154   :  { %v512_v22 = vadd.f32 %v502_v17, %v434_v19  ;;  %v438_v29 = vpop.f32.mrf.mxu0  ;;  %v239_v17 = vadd.f32 %v1126_v4, %v129_v50 }
 0x156   :  { %v520_v26 = vadd.f32 %v863_v23, %v512_v22 }
 0x157   :  { %v507_v32 = vpop.f32.mrf.mxu1 }
 0x158   :  { %v524_v30 = vmax.f32 %v520_v26, 0.0 }
 0x159   :  { %v388_v24 = vpop.f32.mrf.mxu3 }
 0x15a   :  { %v436_v25 = vadd.f32 %v435_v20, %v388_v24  ;;  %v222_v24 = vadd.f32 %v1128_v14, %v128_v49 }
 0x15c   :  { %v513_v27 = vadd.f32 %v504_v21, %v436_v25  ;;  %v440_v37 = vpop.f32.mrf.mxu0  ;;  %v241_v25 = vadd.f32 %v1130_v15, %v129_v50 }
 0x15e   :  { %v521_v28 = vadd.f32 %v863_v23, %v513_v27 }
 0x15f   :  { %v509_v40 = vpop.f32.mrf.mxu1 }
 0x160   :  { %v525_v31 = vmax.f32 %v521_v28, 0.0 }
 0x161   :  { %v391_v33 = vpop.f32.mrf.mxu3 }
 0x162   :  { %v528_v34 = vpack.c.bf16 %v525_v31, %v524_v30  ;;  %v439_v35 = vadd.f32 %v438_v29, %v391_v33 }
 0x164   :  { %813 = vmatmul.msk.bf16.vlgmr.msrb.gmra.mxu2 %vm198_vm0, %v528_v34  ;;  %815 = vmatmul.msk.bf16.vlgmr.msrb.gmra.mxu3 %vm198_vm0, %v528_v34  ;;  %v514_v36 = vadd.f32 %v507_v32, %v439_v35 }
 0x166   :  { %v522_v41 = vadd.f32 %v863_v23, %v514_v36 }
 0x168   :  { %v526_v44 = vmax.f32 %v522_v41, 0.0 }
 0x169   :  { %v393_v38 = vpop.f32.mrf.mxu3 }
 0x16a   :  { %v441_v39 = vadd.f32 %v440_v37, %v393_v38 }
 0x16c   :  { %v515_v42 = vadd.f32 %v509_v40, %v441_v39 }
 0x16e   :  { %v523_v43 = vadd.f32 %v863_v23, %v515_v42 }
 0x170   :  { %v527_v45 = vmax.f32 %v523_v43, 0.0 }
 0x172   :  { %v529_v46 = vpack.c.bf16 %v527_v45, %v526_v44 }
 0x174   :  { %814 = vmatmul.msk.bf16.gmra.mxu2 %vm198_vm0, %v529_v46  ;;  %816 = vmatmul.msk.bf16.gmra.mxu3 %vm198_vm0, %v529_v46 }
 0x1e7   :  { %v599_v55 = vpop.f32.mrf.mxu2  ;;  %v618_v56 = vpop.f32.mrf.mxu3 }
 0x1e8   :  { %v600_v60 = vadd.f32 %v599_v55, %v540_v52  ;;  %v619_v61 = vadd.f32 %v618_v56, %v541_v54 }
 0x1ea   :  { %v628_v62 = vadd.f32 %v600_v60, %v215_v57  ;;  %v629_v1 = vadd.f32 %v619_v61, %v234_v58 }
 0x1ec   :  { %v636_v2 = vmax.f32 %v628_v62, 0.0  ;;  %v637_v3 = vmax.f32 %v629_v1, 0.0 }
 0x1ee   :  { %644 = vst [vmem:[#allocation11] sm:$0xff] %v636_v2 }
 0x1ef   :  { %645 = vst [vmem:[#allocation11 + $0x8] sm:$0xff] %v637_v3  ;;  %v601_v5 = vpop.f32.mrf.mxu2  ;;  %v620_v6 = vpop.f32.mrf.mxu3 }
 0x1f0   :  { %v602_v8 = vadd.f32 %v601_v5, %v540_v52  ;;  %v621_v9 = vadd.f32 %v620_v6, %v541_v54 }
 0x1f2   :  { %v630_v10 = vadd.f32 %v602_v8, %v217_v53  ;;  %v631_v47 = vadd.f32 %v621_v9, %v236_v7 }
 0x1f4   :  { %v638_v11 = vmax.f32 %v630_v10, 0.0  ;;  %v639_v51 = vmax.f32 %v631_v47, 0.0 }
 0x1f6   :  { %646 = vst [vmem:[#allocation11 + $0x10] sm:$0xff] %v638_v11 }
 0x1f7   :  { %647 = vst [vmem:[#allocation11 + $0x18] sm:$0xff] %v639_v51  ;;  %v604_v12 = vpop.f32.mrf.mxu2  ;;  %v623_v13 = vpop.f32.mrf.mxu3 }
 0x1f8   :  { %v605_v18 = vadd.f32 %v604_v12, %v540_v52  ;;  %v624_v19 = vadd.f32 %v623_v13, %v541_v54 }
 0x1fa   :  { %v632_v20 = vadd.f32 %v605_v18, %v220_v16  ;;  %v633_v59 = vadd.f32 %v624_v19, %v239_v17 }
 0x1fc   :  { %v640_v21 = vmax.f32 %v632_v20, 0.0  ;;  %v641_v63 = vmax.f32 %v633_v59, 0.0 }
 0x1fe   :  { %648 = vst [vmem:[#allocation11 + $0x20] sm:$0xff] %v640_v21 }
 0x1ff   :  { %649 = vst [vmem:[#allocation11 + $0x28] sm:$0xff] %v641_v63  ;;  %v606_v22 = vpop.f32.mrf.mxu2  ;;  %v625_v23 = vpop.f32.mrf.mxu3 }
 0x200   :  { %v607_v26 = vadd.f32 %v606_v22, %v540_v52  ;;  %v626_v27 = vadd.f32 %v625_v23, %v541_v54 }
 0x202   :  { %v634_v0 = vadd.f32 %v607_v26, %v222_v24  ;;  %v635_v4 = vadd.f32 %v626_v27, %v241_v25 }
 0x204   :  { %v642_v28 = vmax.f32 %v634_v0, 0.0  ;;  %v643_v29 = vmax.f32 %v635_v4, 0.0 }
 0x206   :  { %650 = vst [vmem:[#allocation11 + $0x30] sm:$0xff] %v642_v28 }
 0x207   :  { %651 = vst [vmem:[#allocation11 + $0x38] sm:$0xff] %v643_v29 }
 0x208   :  { %664 = dma.vmem_to_hbm [thread:$0]  %s657_s30, 1024, %s659_s10, [#allocation4], %s1028_s11, %s1028_s11, %s1029_s12  }
 0x209   :  { %1014 = dma.done.wait [#allocation4], 1024  }
 0x20a   :  { %1015 = vsyncadd [#allocation4], 4294966272 }
 0x20b   :  { %669 = vsyncpa [#allocation3], 1 }
 0x20c   :  { %670 = vsyncpa [#allocation6], 1 }
 0x20d   :  { %671 = vsyncpa [#allocation9], 1 }
 0x20e   :  { %672 = vsyncpa [#allocation4], 1 }

</bundles_post_ra>
